<compile_context>
chip_gen: v7x
topology: tpu7x:2x2x1
jax: 0.10.0
libtpu: 0.0.40
codegen_flags: <defaults>
</compile_context>

<pallas_src>
import functools

import jax
import jax.numpy as jnp
from jax import lax
from jax.experimental import pallas as pl
from jax.experimental.pallas import tpu as pltpu

LANES = 128


def _num_tensorcores():
    # v7x exposes 2 TensorCores per chip; v5e / v6e have 1.
    try:
        kind = jax.devices()[0].device_kind.lower()
    except Exception:
        return 1
    return 2 if ("v7" in kind or "7x" in kind) else 1


def _block_budget_bytes(tc_count):
    # Per-input, per-buffer block byte budget.  2 inputs x 2 pipeline buffers:
    #   1-TC chips: 4 * 4 MiB = 16 MiB   (fits v5e with an explicit vmem raise)
    #   v7x (2 TC): 4 * 8 MiB = 32 MiB   (per-TC, within the 64 MiB physical)
    return (8 << 20) if tc_count > 1 else (4 << 20)


def _hybrid_stats_kernel(pred_ref, true_ref, out_ref, *,
                         num_groups, group_rows, unroll):
    i = pl.program_id(1)

    @pl.when(i == 0)
    def _():
        out_ref[...] = jnp.zeros_like(out_ref)

    zero = jnp.zeros((group_rows, LANES), jnp.float32)

    def body(g, carry):
        sp, st, spp, stt, spt, sse = carry
        off = pl.multiple_of(g * group_rows, group_rows)
        p = pred_ref[pl.ds(off, group_rows), :].astype(jnp.float32)
        t = true_ref[pl.ds(off, group_rows), :].astype(jnp.float32)
        d = p - t
        return (sp + p, st + t, spp + p * p, stt + t * t, spt + p * t,
                sse + d * d)

    sp, st, spp, stt, spt, sse = lax.fori_loop(
        0, num_groups, body, (zero,) * 6, unroll=unroll)

    # Accumulate straight into the resident output block (one block per slice).
    out_ref[0, 0, :, :] += sp     # sum(pred)
    out_ref[0, 1, :, :] += st     # sum(true)
    out_ref[0, 2, :, :] += spp    # sum(pred^2)
    out_ref[0, 3, :, :] += stt    # sum(true^2)
    out_ref[0, 4, :, :] += spt    # sum(pred*true)
    out_ref[0, 5, :, :] += sse    # sum((pred-true)^2)


def hybrid_loss(y_pred, y_true, alpha=0.5):
    assert y_pred.shape == y_true.shape
    n = int(y_pred.size)
    assert n > 0

    p_flat = y_pred.reshape(-1)
    t_flat = y_true.reshape(-1)

    isz_p = jnp.dtype(y_pred.dtype).itemsize
    isz_t = jnp.dtype(y_true.dtype).itemsize
    # Sublane tile height: 8 (f32), 16 (bf16), 32 (int8); take the stricter one.
    group_rows = max(8, 32 // min(isz_p, isz_t))

    tc_count = _num_tensorcores()
    budget = _block_budget_bytes(tc_count)
    max_block_rows = max(
        group_rows,
        (budget // (LANES * max(isz_p, isz_t))) // group_rows * group_rows)

    rows = n // LANES                                        # full 128-lane rows
    block_rows = min(max_block_rows, (rows // group_rows) * group_rows)

    num_blocks = 0
    if block_rows >= group_rows:
        num_blocks_total = rows // block_rows                # full blocks only
        num_slices = tc_count if num_blocks_total >= tc_count else 1
        num_blocks = (num_blocks_total // num_slices) * num_slices
        steps = num_blocks // num_slices

    if num_blocks > 0:
        rows_main = num_blocks * block_rows
        n_main = rows_main * LANES
        # Lane-dense main stream; no full-array pad.  The slice is a no-op when
        # n == n_main.
        # TODO(synk): when a tail exists, XLA may still materialize this slice
        # once; a manual-DMA (pl.ANY) path would avoid even that copy.
        p2 = p_flat[:n_main].reshape(rows_main, LANES)
        t2 = t_flat[:n_main].reshape(rows_main, LANES)

        num_groups = block_rows // group_rows
        unroll = int(min(8, num_groups))

        kernel = functools.partial(
            _hybrid_stats_kernel,
            num_groups=num_groups, group_rows=group_rows, unroll=unroll)

        # 2 pipeline buffers x (pred block + true block) + headroom for the
        # tiny resident output block and compiler scratch.
        block_bytes = block_rows * LANES * (isz_p + isz_t)
        vmem_limit = int(2 * block_bytes + (8 << 20))

        partials = pl.pallas_call(
            kernel,
            out_shape=jax.ShapeDtypeStruct(
                (num_slices, 6, group_rows, LANES), jnp.float32),
            grid_spec=pltpu.PrefetchScalarGridSpec(
                num_scalar_prefetch=0,
                grid=(num_slices, steps),
                in_specs=[
                    pl.BlockSpec((block_rows, LANES),
                                 lambda s, i: (s * steps + i, 0)),
                    pl.BlockSpec((block_rows, LANES),
                                 lambda s, i: (s * steps + i, 0)),
                ],
                out_specs=pl.BlockSpec((1, 6, group_rows, LANES),
                                       lambda s, i: (s, 0, 0, 0)),
            ),
            compiler_params=pltpu.CompilerParams(
                dimension_semantics=("parallel", "arbitrary"),
                vmem_limit_bytes=vmem_limit),
        )(p2, t2)

        stats = jnp.sum(partials, axis=(0, 2, 3))            # (6,)
    else:
        n_main = 0
        stats = jnp.zeros((6,), jnp.float32)

    # Ragged tail (leftover rows + <128-element lane tail): tiny JAX epilogue.
    if n_main < n:
        tp = p_flat[n_main:].astype(jnp.float32)
        tt = t_flat[n_main:].astype(jnp.float32)
        td = tp - tt
        stats = stats + jnp.stack([
            jnp.sum(tp), jnp.sum(tt), jnp.sum(tp * tp), jnp.sum(tt * tt),
            jnp.sum(tp * tt), jnp.sum(td * td)])

    sp, st, spp, stt, spt, sse = (stats[k] for k in range(6))

    n_f = jnp.float32(n)
    mse = sse / n_f
    # TODO(synk): raw-moment cov/var can cancel badly for data with |mean|>>std;
    # a common-offset shift or Kahan accumulation would tighten this if needed.
    cov = spt - sp * st / n_f
    var_p = spp - sp * sp / n_f
    var_t = stt - st * st / n_f
    # NOTE: no epsilon — constant pred/true yields NaN, matching the reference.
    corr = cov / (jnp.sqrt(var_p) * jnp.sqrt(var_t))
    corr_loss = 1.0 - corr
    return jnp.float32(alpha) * mse + jnp.float32(1.0 - alpha) * corr_loss


def _reference(y_pred, y_true, alpha=0.5):
    p = y_pred.reshape(-1).astype(jnp.float32)
    t = y_true.reshape(-1).astype(jnp.float32)
    mse = jnp.mean((p - t) ** 2)
    vp = p - jnp.mean(p)
    vt = t - jnp.mean(t)
    corr = jnp.sum(vp * vt) / (jnp.sqrt(jnp.sum(vp * vp)) * jnp.sqrt(jnp.sum(vt * vt)))
    return alpha * mse + (1.0 - alpha) * (1.0 - corr)


if __name__ == "__main__":
    key = jax.random.PRNGKey(0)
    k1, k2 = jax.random.split(key)
    # NCHW-shaped inputs, as the PyTorch loss would typically receive.
    y_pred = jax.random.normal(k1, (2, 4, 16, 16), dtype=jnp.float32)
    y_true = jax.random.normal(k2, (2, 4, 16, 16), dtype=jnp.float32)

    loss = hybrid_loss(y_pred, y_true, alpha=0.5)
    loss = jax.block_until_ready(loss)

    ref = jax.block_until_ready(_reference(y_pred, y_true, alpha=0.5))
    assert jnp.allclose(loss, ref, rtol=1e-4, atol=1e-5), (loss, ref)

    print("KERNEL_OK")
</pallas_src>

<mosaic_0001>
module attributes {stable_mosaic.version = 11 : i64} {
  func.func @_hybrid_stats_kernel(%arg0: i32, %arg1: i32, %arg2: memref<16x128xf32, #tpu.memory_space<vmem>>, %arg3: memref<16x128xf32, #tpu.memory_space<vmem>>, %arg4: memref<1x6x8x128xf32, #tpu.memory_space<vmem>>) attributes {dimension_semantics = [#tpu.dimension_semantics<parallel>, #tpu.dimension_semantics<arbitrary>], iteration_bounds = array<i64: 1, 1>, scalar_prefetch = 0 : i64, scratch_operands = 0 : i64, tpu.core_type = #tpu.core_type<tc>, window_params = [{transform_indices = @transform_0, window_bounds = array<i64: 16, 128>}, {transform_indices = @transform_1, window_bounds = array<i64: 16, 128>}, {transform_indices = @transform_2, window_bounds = array<i64: 1, 6, 8, 128>}]} {
    %c0_i32 = arith.constant 0 : i32
    %0 = arith.cmpi eq, %arg1, %c0_i32 : i32
    %1 = arith.extui %0 : i1 to i32
    %c0_i32_0 = arith.constant 0 : i32
    %2 = arith.cmpi ne, %1, %c0_i32_0 : i32
    scf.if %2 {
      %cst_49 = arith.constant 0.000000e+00 : f32
      %74 = vector.broadcast %cst_49 : f32 to vector<1x6x8x128xf32>
      %c0_50 = arith.constant 0 : index
      %c0_51 = arith.constant 0 : index
      %c0_52 = arith.constant 0 : index
      %c0_53 = arith.constant 0 : index
      %75 = vector.load %arg4[%c0_50, %c0_51, %c0_52, %c0_53] : memref<1x6x8x128xf32, #tpu.memory_space<vmem>>, vector<1x6x8x128xf32>
      tpu.vector_store %arg4[%c0_50, %c0_51, %c0_52, %c0_53], %74 {strides = array<i32>} : memref<1x6x8x128xf32, #tpu.memory_space<vmem>>, vector<1x6x8x128xf32>,
    } else {
    }
    %cst = arith.constant 0.000000e+00 : f32
    %3 = vector.broadcast %cst : f32 to vector<8x128xf32>
    %c0_i32_1 = arith.constant 0 : i32
    %c8_i32 = arith.constant 8 : i32
    %4 = arith.muli %c0_i32_1, %c8_i32 : i32
    %5 = tpu.assume_multiple %4, 8 : i32
    %6 = arith.index_cast %5 : i32 to index
    %c0 = arith.constant 0 : index
    %7 = vector.load %arg2[%6, %c0] : memref<16x128xf32, #tpu.memory_space<vmem>>, vector<8x128xf32>
    %8 = arith.index_cast %5 : i32 to index
    %c0_2 = arith.constant 0 : index
    %9 = vector.load %arg3[%8, %c0_2] : memref<16x128xf32, #tpu.memory_space<vmem>>, vector<8x128xf32>
    %10 = arith.subf %7, %9 : vector<8x128xf32>
    %11 = arith.addf %3, %7 : vector<8x128xf32>
    %12 = arith.addf %3, %9 : vector<8x128xf32>
    %13 = arith.mulf %7, %7 : vector<8x128xf32>
    %14 = arith.addf %3, %13 : vector<8x128xf32>
    %15 = arith.mulf %9, %9 : vector<8x128xf32>
    %16 = arith.addf %3, %15 : vector<8x128xf32>
    %17 = arith.mulf %7, %9 : vector<8x128xf32>
    %18 = arith.addf %3, %17 : vector<8x128xf32>
    %19 = arith.mulf %10, %10 : vector<8x128xf32>
    %20 = arith.addf %3, %19 : vector<8x128xf32>
    %c1_i32 = arith.constant 1 : i32
    %c8_i32_3 = arith.constant 8 : i32
    %21 = arith.muli %c1_i32, %c8_i32_3 : i32
    %22 = tpu.assume_multiple %21, 8 : i32
    %23 = arith.index_cast %22 : i32 to index
    %c0_4 = arith.constant 0 : index
    %24 = vector.load %arg2[%23, %c0_4] : memref<16x128xf32, #tpu.memory_space<vmem>>, vector<8x128xf32>
    %25 = arith.index_cast %22 : i32 to index
    %c0_5 = arith.constant 0 : index
    %26 = vector.load %arg3[%25, %c0_5] : memref<16x128xf32, #tpu.memory_space<vmem>>, vector<8x128xf32>
    %27 = arith.subf %24, %26 : vector<8x128xf32>
    %28 = arith.addf %11, %24 : vector<8x128xf32>
    %29 = arith.addf %12, %26 : vector<8x128xf32>
    %30 = arith.mulf %24, %24 : vector<8x128xf32>
    %31 = arith.addf %14, %30 : vector<8x128xf32>
    %32 = arith.mulf %26, %26 : vector<8x128xf32>
    %33 = arith.addf %16, %32 : vector<8x128xf32>
    %34 = arith.mulf %24, %26 : vector<8x128xf32>
    %35 = arith.addf %18, %34 : vector<8x128xf32>
    %36 = arith.mulf %27, %27 : vector<8x128xf32>
    %37 = arith.addf %20, %36 : vector<8x128xf32>
    %c2_i32 = arith.constant 2 : i32
    %c0_6 = arith.constant 0 : index
    %c0_7 = arith.constant 0 : index
    %c0_8 = arith.constant 0 : index
    %c0_9 = arith.constant 0 : index
    %38 = vector.load %arg4[%c0_6, %c0_7, %c0_8, %c0_9] : memref<1x6x8x128xf32, #tpu.memory_space<vmem>>, vector<1x1x8x128xf32>
    %39 = vector.shape_cast %38 : vector<1x1x8x128xf32> to vector<8x128xf32>
    %40 = arith.addf %39, %28 : vector<8x128xf32>
    %c0_10 = arith.constant 0 : index
    %c0_11 = arith.constant 0 : index
    %c0_12 = arith.constant 0 : index
    %c0_13 = arith.constant 0 : index
    %41 = vector.load %arg4[%c0_10, %c0_11, %c0_12, %c0_13] : memref<1x6x8x128xf32, #tpu.memory_space<vmem>>, vector<1x1x8x128xf32>
    %42 = vector.shape_cast %41 : vector<1x1x8x128xf32> to vector<8x128xf32>
    %43 = vector.shape_cast %40 : vector<8x128xf32> to vector<1x1x8x128xf32>
    tpu.vector_store %arg4[%c0_10, %c0_11, %c0_12, %c0_13], %43 {strides = array<i32>} : memref<1x6x8x128xf32, #tpu.memory_space<vmem>>, vector<1x1x8x128xf32>,
    %c0_14 = arith.constant 0 : index
    %c1 = arith.constant 1 : index
    %c0_15 = arith.constant 0 : index
    %c0_16 = arith.constant 0 : index
    %44 = vector.load %arg4[%c0_14, %c1, %c0_15, %c0_16] : memref<1x6x8x128xf32, #tpu.memory_space<vmem>>, vector<1x1x8x128xf32>
    %45 = vector.shape_cast %44 : vector<1x1x8x128xf32> to vector<8x128xf32>
    %46 = arith.addf %45, %29 : vector<8x128xf32>
    %c0_17 = arith.constant 0 : index
    %c1_18 = arith.constant 1 : index
    %c0_19 = arith.constant 0 : index
    %c0_20 = arith.constant 0 : index
    %47 = vector.load %arg4[%c0_17, %c1_18, %c0_19, %c0_20] : memref<1x6x8x128xf32, #tpu.memory_space<vmem>>, vector<1x1x8x128xf32>
    %48 = vector.shape_cast %47 : vector<1x1x8x128xf32> to vector<8x128xf32>
    %49 = vector.shape_cast %46 : vector<8x128xf32> to vector<1x1x8x128xf32>
    tpu.vector_store %arg4[%c0_17, %c1_18, %c0_19, %c0_20], %49 {strides = array<i32>} : memref<1x6x8x128xf32, #tpu.memory_space<vmem>>, vector<1x1x8x128xf32>,
    %c0_21 = arith.constant 0 : index
    %c2 = arith.constant 2 : index
    %c0_22 = arith.constant 0 : index
    %c0_23 = arith.constant 0 : index
    %50 = vector.load %arg4[%c0_21, %c2, %c0_22, %c0_23] : memref<1x6x8x128xf32, #tpu.memory_space<vmem>>, vector<1x1x8x128xf32>
    %51 = vector.shape_cast %50 : vector<1x1x8x128xf32> to vector<8x128xf32>
    %52 = arith.addf %51, %31 : vector<8x128xf32>
    %c0_24 = arith.constant 0 : index
    %c2_25 = arith.constant 2 : index
    %c0_26 = arith.constant 0 : index
    %c0_27 = arith.constant 0 : index
    %53 = vector.load %arg4[%c0_24, %c2_25, %c0_26, %c0_27] : memref<1x6x8x128xf32, #tpu.memory_space<vmem>>, vector<1x1x8x128xf32>
    %54 = vector.shape_cast %53 : vector<1x1x8x128xf32> to vector<8x128xf32>
    %55 = vector.shape_cast %52 : vector<8x128xf32> to vector<1x1x8x128xf32>
    tpu.vector_store %arg4[%c0_24, %c2_25, %c0_26, %c0_27], %55 {strides = array<i32>} : memref<1x6x8x128xf32, #tpu.memory_space<vmem>>, vector<1x1x8x128xf32>,
    %c0_28 = arith.constant 0 : index
    %c3 = arith.constant 3 : index
    %c0_29 = arith.constant 0 : index
    %c0_30 = arith.constant 0 : index
    %56 = vector.load %arg4[%c0_28, %c3, %c0_29, %c0_30] : memref<1x6x8x128xf32, #tpu.memory_space<vmem>>, vector<1x1x8x128xf32>
    %57 = vector.shape_cast %56 : vector<1x1x8x128xf32> to vector<8x128xf32>
    %58 = arith.addf %57, %33 : vector<8x128xf32>
    %c0_31 = arith.constant 0 : index
    %c3_32 = arith.constant 3 : index
    %c0_33 = arith.constant 0 : index
    %c0_34 = arith.constant 0 : index
    %59 = vector.load %arg4[%c0_31, %c3_32, %c0_33, %c0_34] : memref<1x6x8x128xf32, #tpu.memory_space<vmem>>, vector<1x1x8x128xf32>
    %60 = vector.shape_cast %59 : vector<1x1x8x128xf32> to vector<8x128xf32>
    %61 = vector.shape_cast %58 : vector<8x128xf32> to vector<1x1x8x128xf32>
    tpu.vector_store %arg4[%c0_31, %c3_32, %c0_33, %c0_34], %61 {strides = array<i32>} : memref<1x6x8x128xf32, #tpu.memory_space<vmem>>, vector<1x1x8x128xf32>,
    %c0_35 = arith.constant 0 : index
    %c4 = arith.constant 4 : index
    %c0_36 = arith.constant 0 : index
    %c0_37 = arith.constant 0 : index
    %62 = vector.load %arg4[%c0_35, %c4, %c0_36, %c0_37] : memref<1x6x8x128xf32, #tpu.memory_space<vmem>>, vector<1x1x8x128xf32>
    %63 = vector.shape_cast %62 : vector<1x1x8x128xf32> to vector<8x128xf32>
    %64 = arith.addf %63, %35 : vector<8x128xf32>
    %c0_38 = arith.constant 0 : index
    %c4_39 = arith.constant 4 : index
    %c0_40 = arith.constant 0 : index
    %c0_41 = arith.constant 0 : index
    %65 = vector.load %arg4[%c0_38, %c4_39, %c0_40, %c0_41] : memref<1x6x8x128xf32, #tpu.memory_space<vmem>>, vector<1x1x8x128xf32>
    %66 = vector.shape_cast %65 : vector<1x1x8x128xf32> to vector<8x128xf32>
    %67 = vector.shape_cast %64 : vector<8x128xf32> to vector<1x1x8x128xf32>
    tpu.vector_store %arg4[%c0_38, %c4_39, %c0_40, %c0_41], %67 {strides = array<i32>} : memref<1x6x8x128xf32, #tpu.memory_space<vmem>>, vector<1x1x8x128xf32>,
    %c0_42 = arith.constant 0 : index
    %c5 = arith.constant 5 : index
    %c0_43 = arith.constant 0 : index
    %c0_44 = arith.constant 0 : index
    %68 = vector.load %arg4[%c0_42, %c5, %c0_43, %c0_44] : memref<1x6x8x128xf32, #tpu.memory_space<vmem>>, vector<1x1x8x128xf32>
    %69 = vector.shape_cast %68 : vector<1x1x8x128xf32> to vector<8x128xf32>
    %70 = arith.addf %69, %37 : vector<8x128xf32>
    %c0_45 = arith.constant 0 : index
    %c5_46 = arith.constant 5 : index
    %c0_47 = arith.constant 0 : index
    %c0_48 = arith.constant 0 : index
    %71 = vector.load %arg4[%c0_45, %c5_46, %c0_47, %c0_48] : memref<1x6x8x128xf32, #tpu.memory_space<vmem>>, vector<1x1x8x128xf32>
    %72 = vector.shape_cast %71 : vector<1x1x8x128xf32> to vector<8x128xf32>
    %73 = vector.shape_cast %70 : vector<8x128xf32> to vector<1x1x8x128xf32>
    tpu.vector_store %arg4[%c0_45, %c5_46, %c0_47, %c0_48], %73 {strides = array<i32>} : memref<1x6x8x128xf32, #tpu.memory_space<vmem>>, vector<1x1x8x128xf32>,
    return
  }
  func.func @transform_0(%arg0: i32, %arg1: i32) -> (i32, i32) {
    %c1_i32 = arith.constant 1 : i32
    %0 = arith.muli %arg0, %c1_i32 : i32
    %1 = arith.addi %0, %arg1 : i32
    %c0_i32 = arith.constant 0 : i32
    %c0_i32_0 = arith.constant 0 : i32
    return %1, %c0_i32 : i32, i32
  }
  func.func @transform_1(%arg0: i32, %arg1: i32) -> (i32, i32) {
    %c1_i32 = arith.constant 1 : i32
    %0 = arith.muli %arg0, %c1_i32 : i32
    %1 = arith.addi %0, %arg1 : i32
    %c0_i32 = arith.constant 0 : i32
    %c0_i32_0 = arith.constant 0 : i32
    return %1, %c0_i32 : i32, i32
  }
  func.func @transform_2(%arg0: i32, %arg1: i32) -> (i32, i32, i32, i32) {
    %c0_i32 = arith.constant 0 : i32
    %c0_i32_0 = arith.constant 0 : i32
    %c0_i32_1 = arith.constant 0 : i32
    %c0_i32_2 = arith.constant 0 : i32
    return %arg0, %c0_i32, %c0_i32_0, %c0_i32_1 : i32, i32, i32, i32
  }
}

</mosaic_0001>

<bundles_post_ra>
// kernel: tpu_custom_call.1
= control target key start
LH: loop header
LB: loop body
LE: loop exit
PB: predicated region body
PF: predicated region fallthrough
CT: control target
= control target key end

     0   :  { %7 = vsyncpa [#allocation3], 0  ;;  %s274_s0 = inlined_call_operand.hbm [shape: f32[16,128], index: 0, kind: input, shape index: {}]   ;;  %s275_s1 = inlined_call_operand.hbm [shape: f32[16,128], index: 1, kind: input, shape index: {}]   ;;  %s276_s2 = inlined_call_operand.hbm [shape: f32[1,6,8,128], index: 2, kind: output, shape index: {}]  }
   0x1   :  { %8 = vsyncpa [#allocation6], 0 }
   0x2   :  { %9 = vsyncpa [#allocation4], 0  ;;  %s209_s9 = smov [#allocation2]   ;;  %s137_s13 = scalar_lea.hbm %s274_s0, 256 }
   0x3   :  { %s19_s10 = sshll.u32 %s209_s9, 4  ;;  %p138_p0 = scmp.ne.s32.totalorder %s274_s0, %s137_s13  ;;  %s20_s10 = int_to_ptr.vmem [resolvable:$true] %s19_s10 }
   0x4   :  { %p141_p1 = scmp.lt.u32.totalorder %s137_s13, %s274_s0 }
   0x6   :  { %p143_p2 = pnand %p141_p1, %p138_p0 }
   0x8   :  { %146 = shalt.err (!%p143_p2)
}
   0x9   :  { %s147_s18 = scalar_lea.vmem %s20_s10, 256  ;;  %p152_p4 = scmp.lt.s32.totalorder %s20_s10, %s20_s10 }
   0xa   :  { %p148_p3 = scmp.ne.s32.totalorder %s20_s10, %s147_s18  ;;  %p153_p5 = scmp.lt.s32.totalorder %s147_s18, %s147_s18 }
   0xc   :  { %p154_p6 = por %p153_p5, %p152_p4 }
   0xe   :  { %p155_p7 = pnand %p154_p6, %p148_p3 }
  0x10   :  { %158 = shalt.err (!%p155_p7)
}
  0x11   :  { %s210_s19 = smov 128   ;;  %s211_s20 = smov 8  }
  0x12   :  { %25 = dma.hbm_to_vmem [thread:$0]  %s274_s0, 256, %s20_s10, [#allocation3], %s210_s19, %s210_s19, %s211_s20  }
  0x13   :  { %s212_s23 = smov [#allocation5]   ;;  %s159_s27 = scalar_lea.hbm %s275_s1, 256 }
  0x14   :  { %s35_s24 = sshll.u32 %s212_s23, 4  ;;  %p160_p8 = scmp.ne.s32.totalorder %s275_s1, %s159_s27  ;;  %s36_s24 = int_to_ptr.vmem [resolvable:$true] %s35_s24 }
  0x15   :  { %p163_p9 = scmp.lt.u32.totalorder %s159_s27, %s275_s1 }
  0x17   :  { %p165_p10 = pnand %p163_p9, %p160_p8 }
  0x19   :  { %168 = shalt.err (!%p165_p10)
}
  0x1a   :  { %s169_s4 = scalar_lea.vmem %s36_s24, 256  ;;  %p174_p12 = scmp.lt.s32.totalorder %s36_s24, %s36_s24 }
  0x1b   :  { %p170_p11 = scmp.ne.s32.totalorder %s36_s24, %s169_s4  ;;  %p175_p13 = scmp.lt.s32.totalorder %s169_s4, %s169_s4 }
  0x1d   :  { %p176_p0 = por %p175_p13, %p174_p12 }
  0x1f   :  { %p177_p1 = pnand %p176_p0, %p170_p11 }
  0x21   :  { %180 = shalt.err (!%p177_p1)
}
  0x22   :  { %41 = dma.hbm_to_vmem [thread:$0]  %s275_s1, 256, %s36_s24, [#allocation6], %s210_s19, %s210_s19, %s211_s20  }
  0x23   :  { %203 = dma.done.wait [#allocation3], 256  }
  0x24   :  { %204 = vsyncadd [#allocation3], 4294967040 }
  0x25   :  { %205 = dma.done.wait [#allocation6], 256  }
  0x26   :  { %206 = vsyncadd [#allocation6], 4294967040  ;;  %v62_v0 = vld [vmem:[#allocation2] sm:$0xff]  ;;  %v76_v1 = vld [vmem:[#allocation2 + $0x8] sm:$0xff]  ;;  %s213_s1 = smov [#allocation7]  }
  0x27   :  { %v63_v2 = vld [vmem:[#allocation5] sm:$0xff]  ;;  %v80_v3 = vadd.f32 %v76_v1, %v62_v0  ;;  %v78_v4 = vld [vmem:[#allocation5 + $0x8] sm:$0xff]  ;;  %v67_v5 = vmul.f32 %v62_v0, %v62_v0  ;;  %v82_v6 = vmul.f32 %v76_v1, %v76_v1  ;;  %s118_s6 = sshll.u32 %s213_s1, 4  ;;  %s119_s6 = int_to_ptr.vmem [resolvable:$true] %s118_s6 }
  0x28   :  { %v69_v7 = vmul.f32 %v63_v2, %v63_v2  ;;  %v81_v8 = vadd.f32 %v78_v4, %v63_v2  ;;  %v84_v9 = vmul.f32 %v78_v4, %v78_v4  ;;  %v71_v10 = vmul.f32 %v63_v2, %v62_v0  ;;  %s181_s7 = scalar_lea.vmem %s119_s6, 768  ;;  %p186_p3 = scmp.lt.s32.totalorder %s119_s6, %s119_s6 }
  0x29   :  { %v86_v11 = vmul.f32 %v78_v4, %v76_v1  ;;  %v83_v12 = vadd.f32 %v82_v6, %v67_v5  ;;  %v64_v13 = vsub.f32 %v62_v0, %v63_v2  ;;  %v79_v14 = vsub.f32 %v76_v1, %v78_v4  ;;  %92 = vst [vmem:[#allocation7] sm:$0xff] %v80_v3  ;;  %p182_p2 = scmp.ne.s32.totalorder %s119_s6, %s181_s7  ;;  %p187_p4 = scmp.lt.s32.totalorder %s181_s7, %s181_s7 }
  0x2a   :  { %v85_v15 = vadd.f32 %v84_v9, %v69_v7  ;;  %96 = vst [vmem:[#allocation7 + $0x8] sm:$0xff] %v81_v8 }
  0x2b   :  { %v87_v16 = vadd.f32 %v86_v11, %v71_v10  ;;  %v73_v17 = vmul.f32 %v64_v13, %v64_v13  ;;  %v88_v18 = vmul.f32 %v79_v14, %v79_v14  ;;  %100 = vst [vmem:[#allocation7 + $0x10] sm:$0xff] %v83_v12  ;;  %p188_p5 = por %p187_p4, %p186_p3 }
  0x2c   :  { %104 = vst [vmem:[#allocation7 + $0x18] sm:$0xff] %v85_v15 }
  0x2d   :  { %v89_v19 = vadd.f32 %v88_v18, %v73_v17  ;;  %108 = vst [vmem:[#allocation7 + $0x20] sm:$0xff] %v87_v16  ;;  %p189_p6 = pnand %p188_p5, %p182_p2 }
  0x2f   :  { %112 = vst [vmem:[#allocation7 + $0x28] sm:$0xff] %v89_v19 }
  0x30   :  { %192 = shalt.err (!%p189_p6)
}
  0x31   :  { %s193_s10 = scalar_lea.hbm %s276_s2, 768 }
  0x32   :  { %p194_p7 = scmp.ne.s32.totalorder %s276_s2, %s193_s10  ;;  %p197_p8 = scmp.lt.u32.totalorder %s193_s10, %s276_s2 }
  0x34   :  { %p199_p9 = pnand %p197_p8, %p194_p7 }
  0x36   :  { %202 = shalt.err (!%p199_p9)
}
  0x37   :  { %124 = dma.vmem_to_hbm [thread:$0]  %s119_s6, 768, %s276_s2, [#allocation4], %s210_s19, %s210_s19, %s211_s20  }
  0x38   :  { %207 = dma.done.wait [#allocation4], 768  }
  0x39   :  { %208 = vsyncadd [#allocation4], 4294966528 }
  0x3a   :  { %128 = vsyncpa [#allocation3], 1 }
  0x3b   :  { %129 = vsyncpa [#allocation6], 1 }
  0x3c   :  { %130 = vsyncpa [#allocation4], 1 }

</bundles_post_ra>
